<compile_context>
chip_gen: v6e
topology: v6e:2x2x1
jax: 0.10.0
libtpu: 0.0.40
codegen_flags: <defaults>
</compile_context>

<pallas_src>
import functools

import jax
import jax.numpy as jnp
import numpy as np
from jax.experimental import pallas as pl
from jax.experimental.pallas import tpu as pltpu

N_EMBEDDING_DIM = 48


def _mha_kernel(x_ref, wqkv_ref, wp_ref, bp_ref, bias_ref, o_ref, *,
                n_heads, head_size, mxu_dtype):
    # x_ref:    (N, C)         batch folded into rows (N = B*T)
    # wqkv_ref: (C, 3*H*hs)    [Wq*scale (head-major) | Wk | Wv], mxu_dtype
    # wp_ref:   (H*hs, C)      output projection weight (as in the module)
    # bp_ref:   (1, C)         output projection bias (f32)
    # bias_ref: (N, N)         additive mask: 0 keep / -1e30 drop (f32)
    # o_ref:    (N, C)
    H, hs = n_heads, head_size
    Hh = H * hs
    N = x_ref.shape[0]

    # ---- Fused QKV projection: one lane-dense MXU op (144 output lanes). ----
    x = x_ref[...].astype(mxu_dtype)
    qkv = jnp.dot(x, wqkv_ref[...],
                  preferred_element_type=jnp.float32)            # (N, 3*H*hs) f32

    def to_heads(t):                       # (N, H*hs) -> (H, N, hs)
        return jnp.swapaxes(t.reshape(N, H, hs), 0, 1)

    q = to_heads(qkv[:, 0 * Hh:1 * Hh])    # scale (C**-0.5) folded into Wq
    k = to_heads(qkv[:, 1 * Hh:2 * Hh])
    v = to_heads(qkv[:, 2 * Hh:3 * Hh])

    # ---- Scores + masked, max-subtracted softmax (kept in f32). ----
    s = jnp.einsum('hnd,hmd->hnm', q.astype(mxu_dtype), k.astype(mxu_dtype),
                   preferred_element_type=jnp.float32)           # (H, N, N)
    s = s + bias_ref[...]                  # trace-time constant additive mask
    m = jnp.max(s, axis=-1, keepdims=True)
    e = jnp.exp(s - m)
    denom = jnp.sum(e, axis=-1, keepdims=True)                   # (H, N, 1)
    # (attention dropout: identity in eval mode)

    # ---- P@V with UNNORMALIZED probs; normalize afterwards (cheaper). ----
    o = jnp.einsum('hnm,hmd->hnd', e.astype(mxu_dtype), v.astype(mxu_dtype),
                   preferred_element_type=jnp.float32)           # (H, N, hs)
    # Deferred normalization: O(H*N*hs) multiplies instead of O(H*N*N).
    # Exact EUP reciprocal; with the multiply this cheap, approx=True buys ~0.
    o = o * pl.reciprocal(denom, approx=False)

    # ---- Output projection: (N, H*hs) @ (H*hs, C) -- one MXU push. ----
    oc = jnp.swapaxes(o, 0, 1).reshape(N, Hh)                    # head-major concat
    out = jnp.dot(oc.astype(mxu_dtype), wp_ref[...],
                  preferred_element_type=jnp.float32) + bp_ref[...]
    # (output dropout: identity in eval mode)

    # NOTE: C = 48 (< 128 lanes) makes this store lane-masked; negligible at
    # toy size.  At scaled shapes present a lane-dense (multiple-of-128) slab.
    o_ref[...] = out.astype(o_ref.dtype)


def prepare_mha_params(wq, wk, wv, wp, bp, mxu_dtype=jnp.float32):
    """One-time parameter preparation (hoisted out of the per-call path).

    wq/wk/wv: (H, C, hs) per-head Linear weights (pre-transposed, no bias).
    wp: (H*hs, C) projection weight; bp: (1, C) projection bias.
    Returns (wqkv2d, wp2d, bp2d) with the softmax scale (C**-0.5, embedding
    dim -- exactly as Head.forward) folded into Wq, MXU operands cast to
    `mxu_dtype`, bias kept in f32.
    """
    H, C, hs = wq.shape
    scale = C ** (-0.5)
    q2 = (wq * scale).transpose(1, 0, 2).reshape(C, H * hs)   # head-major columns
    k2 = wk.transpose(1, 0, 2).reshape(C, H * hs)
    v2 = wv.transpose(1, 0, 2).reshape(C, H * hs)
    wqkv = jnp.concatenate([q2, k2, v2], axis=-1).astype(mxu_dtype)  # (C, 3*H*hs)
    return wqkv, wp.astype(mxu_dtype), bp.reshape(1, C).astype(jnp.float32)


def multi_head_attention(x, wqkv, wp, bp, *, n_heads, head_size,
                         mxu_dtype=jnp.float32):
    """x: (B, T, C); wqkv/wp/bp: outputs of prepare_mha_params."""
    B, T, C = x.shape
    H, hs = n_heads, head_size
    N = B * T
    x2d = x.reshape(N, C)

    # Compile-time additive mask (B, T are static): rows/cols must belong to
    # the same batch element AND obey causality inside it.  Diagonal always
    # kept, so no row is fully masked; large finite negative avoids -inf math.
    row = np.arange(N)[:, None]
    col = np.arange(N)[None, :]
    keep = ((row // T) == (col // T)) & ((col % T) <= (row % T))
    bias = jnp.asarray(np.where(keep, 0.0, -1e30), dtype=jnp.float32)   # (N, N)

    flops = (2 * N * C * 3 * H * hs          # fused QKV projection
             + 2 * H * N * N * hs            # scores
             + 2 * H * N * N * hs            # probs @ V
             + 2 * N * H * hs * C)           # output projection
    bytes_accessed = int(x2d.nbytes + wqkv.nbytes + wp.nbytes + bp.nbytes
                         + bias.nbytes + N * C * x.dtype.itemsize)

    kernel = functools.partial(_mha_kernel, n_heads=H, head_size=hs,
                               mxu_dtype=mxu_dtype)

    out2d = pl.pallas_call(
        kernel,
        out_shape=jax.ShapeDtypeStruct((N, C), x.dtype),
        # Everything fits comfortably in VMEM at these shapes, so the whole
        # problem runs in a single grid-less invocation (no per-step pipeline
        # overhead).  TODO(synk): at large B/T the folded-batch (N=B*T) score
        # tensor scales as B^2*T^2 -- switch to a batched/gridded flash layout
        # (batch/query axis "parallel" so v7x's 2 TensorCores are both fed,
        # KV/reduction axis last + "arbitrary") and set
        # pltpu.CompilerParams(vmem_limit_bytes=...) against the per-chip
        # VMEM budget (64 MiB on v7x vs 128 MiB on v5e/v6e).
        in_specs=[
            pl.BlockSpec(memory_space=pltpu.MemorySpace.VMEM),   # x2d
            pl.BlockSpec(memory_space=pltpu.MemorySpace.VMEM),   # wqkv
            pl.BlockSpec(memory_space=pltpu.MemorySpace.VMEM),   # wp
            pl.BlockSpec(memory_space=pltpu.MemorySpace.VMEM),   # bp
            pl.BlockSpec(memory_space=pltpu.MemorySpace.VMEM),   # mask bias
        ],
        out_specs=pl.BlockSpec(memory_space=pltpu.MemorySpace.VMEM),
        cost_estimate=pl.CostEstimate(
            flops=flops,
            transcendentals=H * N * N,
            bytes_accessed=bytes_accessed),
    )(x2d, wqkv, wp, bp, bias)
    return out2d.reshape(B, T, C)


def _reference(x, wq, wk, wv, wp, bp):
    """Pure-JAX port of the PyTorch MultiHeadAttention forward (eval mode)."""
    B, T, C = x.shape
    H = wq.shape[0]
    scale = C ** (-0.5)
    mask = jnp.tril(jnp.ones((T, T), dtype=bool))
    outs = []
    for h in range(H):
        q = x @ wq[h]
        k = x @ wk[h]
        v = x @ wv[h]
        wei = jnp.einsum("btd,bsd->bts", q, k) * scale
        wei = jnp.where(mask[None], wei, -jnp.inf)
        wei = jax.nn.softmax(wei, axis=-1)
        outs.append(jnp.einsum("bts,bsd->btd", wei, v))
    cat = jnp.concatenate(outs, axis=-1)
    return cat @ wp + bp


if __name__ == "__main__":
    # Small shapes consistent with the module: C = 48, n_heads * head_size = C
    B, T, C = 2, 8, N_EMBEDDING_DIM
    H, hs = 4, 12

    key = jax.random.PRNGKey(0)
    kx, kq, kk, kv, kp, kb = jax.random.split(key, 6)

    x = jax.random.normal(kx, (B, T, C), dtype=jnp.float32)
    # deterministic parameter init (stand-in for nn.Linear weights, pre-transposed)
    wq = jax.random.normal(kq, (H, C, hs), dtype=jnp.float32) * (C ** -0.5)
    wk = jax.random.normal(kk, (H, C, hs), dtype=jnp.float32) * (C ** -0.5)
    wv = jax.random.normal(kv, (H, C, hs), dtype=jnp.float32) * (C ** -0.5)
    wp = jax.random.normal(kp, (H * hs, C), dtype=jnp.float32) * ((H * hs) ** -0.5)
    bp = jax.random.normal(kb, (1, C), dtype=jnp.float32) * 0.01

    ref = jax.block_until_ready(_reference(x, wq, wk, wv, wp, bp))

    # --- f32 MXU-operand path: exact, tight tolerance -----------------------
    wqkv32, wp32, bp32 = prepare_mha_params(wq, wk, wv, wp, bp, jnp.float32)
    out32 = jax.block_until_ready(
        multi_head_attention(x, wqkv32, wp32, bp32,
                             n_heads=H, head_size=hs, mxu_dtype=jnp.float32))
    np.testing.assert_allclose(np.asarray(out32), np.asarray(ref),
                               rtol=1e-4, atol=1e-5)

    # --- bf16 MXU-operand path (f32 accumulation + f32 softmax) -------------
    wqkv16, wp16, bp16 = prepare_mha_params(wq, wk, wv, wp, bp, jnp.bfloat16)
    out16 = jax.block_until_ready(
        multi_head_attention(x, wqkv16, wp16, bp16,
                             n_heads=H, head_size=hs, mxu_dtype=jnp.bfloat16))
    np.testing.assert_allclose(np.asarray(out16), np.asarray(ref),
                               rtol=5e-2, atol=5e-2)

    print("KERNEL_OK")
</pallas_src>

<mosaic_0001>
module attributes {stable_mosaic.version = 11 : i64} {
  func.func @_mha_kernel(%arg0: memref<16x48xf32, #tpu.memory_space<vmem>>, %arg1: memref<48x144xf32, #tpu.memory_space<vmem>>, %arg2: memref<48x48xf32, #tpu.memory_space<vmem>>, %arg3: memref<1x48xf32, #tpu.memory_space<vmem>>, %arg4: memref<16x16xf32, #tpu.memory_space<vmem>>, %arg5: memref<16x48xf32, #tpu.memory_space<vmem>>) attributes {dimension_semantics = [], scalar_prefetch = 0 : i64, scratch_operands = 0 : i64, tpu.core_type = #tpu.core_type<tc>} {
    %c0 = arith.constant 0 : index
    %c0_0 = arith.constant 0 : index
    %0 = vector.load %arg0[%c0, %c0_0] : memref<16x48xf32, #tpu.memory_space<vmem>>, vector<16x48xf32>
    %c0_1 = arith.constant 0 : index
    %c0_2 = arith.constant 0 : index
    %1 = vector.load %arg1[%c0_1, %c0_2] : memref<48x144xf32, #tpu.memory_space<vmem>>, vector<48x144xf32>
    %cst = arith.constant dense<0.000000e+00> : vector<16x144xf32>
    %2 = tpu.matmul %0, %1, %cst {dimension_numbers = #tpu.dot_dimension_numbers<[1], [0], [0], [1], [0, 0, 1, 1], [], []>} : vector<16x48xf32>, vector<48x144xf32>, vector<16x144xf32> -> vector<16x144xf32>
    %3 = vector.extract_strided_slice %2 {offsets = [0, 0], sizes = [16, 48], strides = [1, 1]} : vector<16x144xf32> to vector<16x48xf32>
    %4 = vector.shape_cast %3 : vector<16x48xf32> to vector<16x4x12xf32>
    %5 = tpu.transpose %4, [1, 0, 2] : vector<16x4x12xf32> -> vector<4x16x12xf32>
    %6 = vector.extract_strided_slice %2 {offsets = [0, 48], sizes = [16, 48], strides = [1, 1]} : vector<16x144xf32> to vector<16x48xf32>
    %7 = vector.shape_cast %6 : vector<16x48xf32> to vector<16x4x12xf32>
    %8 = tpu.transpose %7, [1, 0, 2] : vector<16x4x12xf32> -> vector<4x16x12xf32>
    %9 = vector.extract_strided_slice %2 {offsets = [0, 96], sizes = [16, 48], strides = [1, 1]} : vector<16x144xf32> to vector<16x48xf32>
    %10 = vector.shape_cast %9 : vector<16x48xf32> to vector<16x4x12xf32>
    %11 = tpu.transpose %10, [1, 0, 2] : vector<16x4x12xf32> -> vector<4x16x12xf32>
    "tpu.trace_start"() <{level = 10 : i32, message = "hnd,hmd->hnm"}> : () -> ()
    %cst_3 = arith.constant dense<0.000000e+00> : vector<4x16x16xf32>
    %12 = tpu.matmul %5, %8, %cst_3 {dimension_numbers = #tpu.dot_dimension_numbers<[2], [2], [1], [1], [0, 0, 0, 1, 1, 1], [0], [0]>} : vector<4x16x12xf32>, vector<4x16x12xf32>, vector<4x16x16xf32> -> vector<4x16x16xf32>
    "tpu.trace_stop"() : () -> ()
    %c0_4 = arith.constant 0 : index
    %c0_5 = arith.constant 0 : index
    %13 = vector.load %arg4[%c0_4, %c0_5] : memref<16x16xf32, #tpu.memory_space<vmem>>, vector<16x16xf32>
    %14 = vector.shape_cast %13 : vector<16x16xf32> to vector<1x16x16xf32>
    %15 = vector.broadcast %14 : vector<1x16x16xf32> to vector<4x16x16xf32>
    %16 = arith.addf %12, %15 : vector<4x16x16xf32>
    %cst_6 = arith.constant dense<0xFF800000> : vector<4x16xf32>
    %17 = vector.multi_reduction <maximumf>, %16, %cst_6 [2] : vector<4x16x16xf32> to vector<4x16xf32>
    %18 = vector.shape_cast %17 : vector<4x16xf32> to vector<4x16x1xf32>
    %19 = vector.broadcast %18 : vector<4x16x1xf32> to vector<4x16x16xf32>
    %20 = arith.subf %16, %19 : vector<4x16x16xf32>
    %21 = math.exp %20 : vector<4x16x16xf32>
    %cst_7 = arith.constant dense<0.000000e+00> : vector<4x16xf32>
    %22 = vector.multi_reduction <add>, %21, %cst_7 [2] : vector<4x16x16xf32> to vector<4x16xf32>
    %23 = vector.shape_cast %22 : vector<4x16xf32> to vector<4x16x1xf32>
    "tpu.trace_start"() <{level = 10 : i32, message = "hnm,hmd->hnd"}> : () -> ()
    %cst_8 = arith.constant dense<0.000000e+00> : vector<4x16x12xf32>
    %24 = tpu.matmul %21, %11, %cst_8 {dimension_numbers = #tpu.dot_dimension_numbers<[2], [1], [1], [2], [0, 0, 0, 1, 1, 2], [0], [0]>} : vector<4x16x16xf32>, vector<4x16x12xf32>, vector<4x16x12xf32> -> vector<4x16x12xf32>
    "tpu.trace_stop"() : () -> ()
    %25 = tpu.reciprocal %23 : vector<4x16x1xf32> -> vector<4x16x1xf32>
    %26 = vector.broadcast %25 : vector<4x16x1xf32> to vector<4x16x12xf32>
    %27 = arith.mulf %24, %26 : vector<4x16x12xf32>
    %28 = tpu.transpose %27, [1, 0, 2] : vector<4x16x12xf32> -> vector<16x4x12xf32>
    %29 = vector.shape_cast %28 : vector<16x4x12xf32> to vector<16x48xf32>
    %c0_9 = arith.constant 0 : index
    %c0_10 = arith.constant 0 : index
    %30 = vector.load %arg2[%c0_9, %c0_10] : memref<48x48xf32, #tpu.memory_space<vmem>>, vector<48x48xf32>
    %cst_11 = arith.constant dense<0.000000e+00> : vector<16x48xf32>
    %31 = tpu.matmul %29, %30, %cst_11 {dimension_numbers = #tpu.dot_dimension_numbers<[1], [0], [0], [1], [0, 0, 1, 1], [], []>} : vector<16x48xf32>, vector<48x48xf32>, vector<16x48xf32> -> vector<16x48xf32>
    %c0_12 = arith.constant 0 : index
    %c0_13 = arith.constant 0 : index
    %32 = vector.load %arg3[%c0_12, %c0_13] : memref<1x48xf32, #tpu.memory_space<vmem>>, vector<1x48xf32>
    %33 = vector.broadcast %32 : vector<1x48xf32> to vector<16x48xf32>
    %34 = arith.addf %31, %33 : vector<16x48xf32>
    %c0_14 = arith.constant 0 : index
    %c0_15 = arith.constant 0 : index
    %35 = vector.load %arg5[%c0_14, %c0_15] : memref<16x48xf32, #tpu.memory_space<vmem>>, vector<16x48xf32>
    tpu.vector_store %arg5[%c0_14, %c0_15], %34 {strides = array<i32>} : memref<16x48xf32, #tpu.memory_space<vmem>>, vector<16x48xf32>,
    return
  }
}

</mosaic_0001>

<bundles_post_ra>
// kernel: tpu_custom_call.1
= control target key start
LH: loop header
LB: loop body
LE: loop exit
PB: predicated region body
PF: predicated region fallthrough
CT: control target
= control target key end

     0   :  { %10 = vsyncpa [#allocation3], 0  ;;  %s2994_s0 = inlined_call_operand.hbm [shape: f32[16,48], index: 0, kind: input, shape index: {}]   ;;  %s2995_s1 = inlined_call_operand.hbm [shape: f32[48,144], index: 1, kind: input, shape index: {}]   ;;  %s2996_s2 = inlined_call_operand.hbm [shape: f32[48,48], index: 2, kind: input, shape index: {}]   ;;  %s2997_s3 = inlined_call_operand.vmem [shape: f32[1,48], index: 3, kind: input, shape index: {}]   ;;  %s2998_s4 = inlined_call_operand.hbm [shape: f32[16,16], index: 4, kind: input, shape index: {}]   ;;  %s2999_s5 = inlined_call_operand.hbm [shape: f32[16,48], index: 5, kind: output, shape index: {}]  }
   0x1   :  { %11 = vsyncpa [#allocation6], 0 }
   0x2   :  { %12 = vsyncpa [#allocation9], 0 }
   0x3   :  { %13 = vsyncpa [#allocation4], 0  ;;  %s2570_s18 = smov [#allocation5]  }
   0x4   :  { %s31_s19 = sshll.u32 %s2570_s18, 4  ;;  %s32_s19 = int_to_ptr.vmem [resolvable:$true] %s31_s19 }
   0x5   :  { %s2470_s20 = scalar_lea.vmem %s32_s19, 1536  ;;  %p2475_p1 = scmp.lt.s32.totalorder %s32_s19, %s32_s19 }
   0x6   :  { %p2471_p0 = scmp.ne.s32.totalorder %s32_s19, %s2470_s20  ;;  %p2476_p2 = scmp.lt.s32.totalorder %s2470_s20, %s2470_s20 }
   0x8   :  { %p2477_p3 = por %p2476_p2, %p2475_p1 }
   0xa   :  { %p2478_p4 = pnand %p2477_p3, %p2471_p0 }
   0xc   :  { %2481 = shalt.err (!%p2478_p4)
}
   0xd   :  { %s2571_s21 = smov 256   ;;  %s2572_s22 = smov 16  }
   0xe   :  { %37 = dma.hbm_to_vmem [thread:$0]  %s2995_s1, 1536, %s32_s19, [#allocation6], %s2571_s21, %s2571_s21, %s2572_s22  }
   0xf   :  { %s2573_s25 = smov [#allocation2]  }
  0x10   :  { %s19_s26 = sshll.u32 %s2573_s25, 4  ;;  %s20_s26 = int_to_ptr.vmem [resolvable:$true] %s19_s26 }
  0x11   :  { %s2490_s27 = scalar_lea.vmem %s20_s26, 256  ;;  %p2495_p6 = scmp.lt.s32.totalorder %s20_s26, %s20_s26 }
  0x12   :  { %p2491_p5 = scmp.ne.s32.totalorder %s20_s26, %s2490_s27  ;;  %p2496_p7 = scmp.lt.s32.totalorder %s2490_s27, %s2490_s27 }
  0x14   :  { %p2497_p8 = por %p2496_p7, %p2495_p6 }
  0x16   :  { %p2498_p9 = pnand %p2497_p8, %p2491_p5 }
  0x18   :  { %2501 = shalt.err (!%p2498_p9)
}
  0x19   :  { %s2574_s28 = smov 128   ;;  %s2575_s29 = smov 8  }
  0x1a   :  { %25 = dma.hbm_to_vmem [thread:$0]  %s2994_s0, 256, %s20_s26, [#allocation3], %s2574_s28, %s2574_s28, %s2575_s29  }
  0x1b   :  { %s2576_s1 = smov [#allocation7]   ;;  %s2577_s8 = smov [#allocation8]  }
  0x1c   :  { %s43_s7 = sshll.u32 %s2576_s1, 4  ;;  %s57_s9 = sshll.u32 %s2577_s8, 4  ;;  %s44_s7 = int_to_ptr.vmem [resolvable:$true] %s43_s7  ;;  %s58_s9 = int_to_ptr.vmem [resolvable:$true] %s57_s9 }
  0x1d   :  { %s2510_s10 = scalar_lea.vmem %s44_s7, 768  ;;  %p2515_p11 = scmp.lt.s32.totalorder %s44_s7, %s44_s7 }
  0x1e   :  { %p2511_p10 = scmp.ne.s32.totalorder %s44_s7, %s2510_s10  ;;  %p2516_p12 = scmp.lt.s32.totalorder %s2510_s10, %s2510_s10 }
  0x20   :  { %p2517_p13 = por %p2516_p12, %p2515_p11 }
  0x22   :  { %p2518_p0 = pnand %p2517_p13, %p2511_p10 }
  0x24   :  { %2521 = shalt.err (!%p2518_p0)
}
  0x25   :  { %49 = dma.hbm_to_vmem [thread:$0]  %s2996_s2, 768, %s44_s7, [#allocation6], %s2574_s28, %s2574_s28, %s2575_s29  }
  0x26   :  { %s2530_s0 = scalar_lea.vmem %s58_s9, 256  ;;  %p2535_p2 = scmp.lt.s32.totalorder %s58_s9, %s58_s9 }
  0x27   :  { %p2531_p1 = scmp.ne.s32.totalorder %s58_s9, %s2530_s0  ;;  %p2536_p3 = scmp.lt.s32.totalorder %s2530_s0, %s2530_s0 }
  0x29   :  { %p2537_p4 = por %p2536_p3, %p2535_p2 }
  0x2b   :  { %p2538_p5 = pnand %p2537_p4, %p2531_p1 }
  0x2d   :  { %2541 = shalt.err (!%p2538_p5)
}
  0x2e   :  { %63 = dma.hbm_to_vmem [thread:$0]  %s2998_s4, 256, %s58_s9, [#allocation9], %s2574_s28, %s2574_s28, %s2575_s29  }
  0x2f   :  { %2562 = dma.done.wait [#allocation3], 256  }
  0x30   :  { %2563 = vsyncadd [#allocation3], 4294967040 }
  0x31   :  { %2564 = dma.done.wait [#allocation6], 2304  }
  0x32   :  { %2565 = vsyncadd [#allocation6], 4294964992 }
  0x33   :  { %2566 = dma.done.wait [#allocation9], 256  }
  0x34   :  { %2567 = vsyncadd [#allocation9], 4294967040  ;;  %v2578_v0 = vmov 0.0   ;;  %v89_v1 = vld [vmem:[#allocation5 + $0x58] sm:$0xff]  ;;  %v88_v2 = vld [vmem:[#allocation5 + $0x50] sm:$0xff]  ;;  %vm90_vm0 = vcmask 392192   ;;  %v199_v20 = vlaneseq }
  0x35   :  { %161 = vmatprep.mubr.f32.mxu0 %v2578_v0  ;;  %v87_v3 = vld [vmem:[#allocation5 + $0x48] sm:$0xff]  ;;  %117 = vmatprep.subr.mxu0 %v89_v1  ;;  %v86_v4 = vld [vmem:[#allocation5 + $0x40] sm:$0xff]  ;;  %v85_v5 = vld [vmem:[#allocation5 + $0x38] sm:$0xff]  ;;  %s2579_s2 = smov 116   ;;  %s2580_s4 = smov 92   ;;  %vm1073_vm1 = vcmask 97280  }
  0x36   :  { %118 = vmatpush1.msra.mxu0 %v88_v2  ;;  %v84_v6 = vld [vmem:[#allocation5 + $0x30] sm:$0xff]  ;;  %v83_v7 = vld [vmem:[#allocation5 + $0x28] sm:$0xff]  ;;  %v82_v8 = vld [vmem:[#allocation5 + $0x20] sm:$0xff]  ;;  %s2581_s15 = smov 104   ;;  %s2582_s16 = smov 80   ;;  %v200_v25 = vshrl.u32 %v199_v20, 7 }
  0x37   :  { %119 = vmatprep.subr.mxu0 %v87_v3  ;;  %v81_v9 = vld [vmem:[#allocation5 + $0x18] sm:$0xff]  ;;  %v80_v10 = vld [vmem:[#allocation5 + $0x10] sm:$0xff]  ;;  %v79_v11 = vld [vmem:[#allocation5 + $0x8] sm:$0xff]  ;;  %v2583_v18 = vmov 1983009808   ;;  %s2585_s17 = smov 32  }
  0x38   :  { %120 = vmatpush1.msra.mxu0 %v86_v4  ;;  %v78_v12 = vld [vmem:[#allocation5] sm:$0xff]  ;;  %v76_v13 = vld [vmem:[#allocation2] sm:$0xff]  ;;  %v77_v14 = vld [vmem:[#allocation2 + $0x8] sm:$0xff]  ;;  %v197_v19 = vunpack.c.l.s4 %v2583_v18  ;;  %v2584_v22 = vmov 1934713408   ;;  %vm768_vm2 = vcmask 850944  }
  0x39   :  { %121 = vmatprep.subr.mxu0 %v85_v5  ;;  %v229_v23 = vunpack.c.l.s4 %v2584_v22  ;;  %vm1422_vm3 = vcmask 130048   ;;  %s2586_s18 = smov 24   ;;  %s2587_s19 = smov 12   ;;  %vm2136_vm4 = vcmask 293888   ;;  %vm2133_vm5 = vcmask 195584  }
  0x3a   :  { %122 = vmatpush1.msra.mxu0 %v84_v6  ;;  %v198_v24 = vunpack.c.0.s8 %v197_v19  ;;  %s2588_s20 = smov 36   ;;  %s2589_s23 = smov [#allocation10]  }
  0x3b   :  { %123 = vmatprep.subr.mxu0 %v83_v7  ;;  %v230_v30 = vunpack.c.0.s8 %v229_v23  ;;  %s2240_s24 = sshll.u32 %s2589_s23, 4  ;;  %s2241_s24 = int_to_ptr.vmem [resolvable:$true] %s2240_s24 }
  0x3c   :  { %124 = vmatpush1.msra.mxu0 %v82_v8  ;;  %v2673_v31 = vsub.s32 %v198_v24, %v200_v25  ;;  %s2542_s25 = scalar_lea.vmem %s2241_s24, 256  ;;  %p2547_p7 = scmp.lt.s32.totalorder %s2241_s24, %s2241_s24 }
  0x3d   :  { %125 = vmatprep.subr.mxu0 %v81_v9  ;;  %v2682_v36 = vsub.s32 %v230_v30, %v200_v25  ;;  %p2543_p6 = scmp.ne.s32.totalorder %s2241_s24, %s2542_s25  ;;  %p2548_p8 = scmp.lt.s32.totalorder %s2542_s25, %s2542_s25 }
  0x3e   :  { %126 = vmatpush1.msra.mxu0 %v80_v10 }
  0x3f   :  { %127 = vmatprep.subr.mxu0 %v79_v11  ;;  %p2549_p9 = por %p2548_p8, %p2547_p7 }
  0x40   :  { %128 = vmatpush1.msra.mxu0 %v78_v12 }
  0x41   :  { %2254 = vmatmul.mubr.msk.f32.vlgmr.msra.gmra.mxu0 %vm90_vm0, %v76_v13  ;;  %p2550_p10 = pnand %p2549_p9, %p2543_p6 }
  0x42   :  { %167 = vmatprep.mubr.f32.mxu0 %v2578_v0 }
  0x45   :  { %2255 = vmatmul.mubr.msk.f32.gmra.mxu0 %vm90_vm0, %v77_v14 }
 0x101   :  { %v2643_v15 = vpop.f32.mrf.mxu0 }
 0x102   :  { %176 = vrot.lane.b32.xlu1 %v2643_v15, %s2579_s2 }
 0x103   :  { %v2646_v16 = vpop.f32.mrf.mxu0 }
 0x105   :  { %v2648_v17 = vpop.f32.mrf.mxu0 }
 0x106   :  { %190 = vrot.lane.b32.xlu1 %v2648_v17, %s2580_s4  ;;  %178 = vrot.lane.b32.xlu0 %v2648_v17, %s2579_s2 }
 0x107   :  { %v171_v54 = vpop.f32.mrf.mxu0 }
 0x10a   :  { %188 = vrot.lane.b32.xlu1 %v2643_v15, %s2580_s4  ;;  %184 = vrot.lane.b32.xlu0 %v2648_v17, %s2581_s15 }
 0x10e   :  { %182 = vrot.lane.b32.xlu0 %v2643_v15, %s2581_s15 }
 0x112   :  { %466 = vrot.lane.b32.xlu0 %v2643_v15, %s2582_s16 }
 0x116   :  { %468 = vrot.lane.b32.xlu0 %v2648_v17, %s2582_s16 }
 0x174   :  { %v2663_v21 = vpop.permute.xlu1 %176 }
 0x175   :  { %470 = vrot.lane.b32.xlu1 %v2663_v21, %s2582_s16 }
 0x178   :  { %v191_v26 = vpop.permute.xlu1 %190  ;;  %v2667_v27 = vpop.permute.xlu0 %178 }
 0x179   :  { %v278_v28 = vcombine.low %v2667_v27, %v191_v26  ;;  %v279_v29 = vcombine.high %v2667_v27, %v191_v26  ;;  %472 = vrot.lane.b32.xlu1 %v2667_v27, %s2582_s16 }
 0x17b   :  { %v286_v37 = vrot.slane %v278_v28, %v2673_v31  ;;  %v293_v38 = vrot.slane %v279_v29, %v2673_v31 }
 0x17c   :  { %v2675_v32 = vpop.permute.xlu0 %184  ;;  %v189_v33 = vpop.permute.xlu1 %188 }
 0x17d   :  { %v262_v34 = vcombine.low %v2648_v17, %v2675_v32  ;;  %v263_v35 = vcombine.high %v2648_v17, %v2675_v32  ;;  %480 = vrot.lane.b32.xlu1 %v191_v26, %s2582_s16  ;;  %476 = vrot.lane.b32.xlu0 %v2675_v32, %s2582_s16  ;;  %v210_v41 = vcombine.low %v2663_v21, %v189_v33 }
 0x17e   :  { %v211_v42 = vcombine.high %v2663_v21, %v189_v33 }
 0x17f   :  { %v270_v39 = vrot.slane %v262_v34, %v2673_v31  ;;  %v277_v40 = vrot.slane %v263_v35, %v2673_v31  ;;  %v218_v55 = vrot.slane %v210_v41, %v2673_v31 }
 0x180   :  { %v2692_v43 = vpop.permute.xlu0 %182  ;;  %v225_v56 = vrot.slane %v211_v42, %v2673_v31 }
 0x181   :  { %v294_v44 = vcombine.low %v270_v39, %v286_v37  ;;  %v295_v45 = vcombine.high %v270_v39, %v286_v37  ;;  %v310_v46 = vcombine.low %v277_v40, %v293_v38  ;;  %v311_v47 = vcombine.high %v277_v40, %v293_v38  ;;  %478 = vrot.lane.b32.xlu1 %v189_v33, %s2582_s16 }
 0x182   :  { %v194_v48 = vcombine.low %v2643_v15, %v2692_v43  ;;  %v195_v49 = vcombine.high %v2643_v15, %v2692_v43  ;;  %474 = vrot.lane.b32.xlu0 %v2692_v43, %s2582_s16 }
 0x183   :  { %v302_v50 = vrot.slane %v294_v44, %v2682_v36  ;;  %v309_v51 = vrot.slane %v295_v45, %v2682_v36  ;;  %v318_v52 = vrot.slane %v310_v46, %v2682_v36  ;;  %v325_v53 = vrot.slane %v311_v47, %v2682_v36 }
 0x184   :  { %v202_v57 = vrot.slane %v194_v48, %v2673_v31  ;;  %v209_v58 = vrot.slane %v195_v49, %v2673_v31  ;;  %v467_v49 = vpop.permute.xlu0 %466 }
 0x185   :  { %v398_v59 = vcombine.low %v302_v50, %v309_v51  ;;  %v2258_v60 = vcombine.high %v302_v50, %v309_v51  ;;  %v414_v61 = vcombine.low %v318_v52, %v325_v53  ;;  %v2259_v62 = vcombine.high %v318_v52, %v325_v53  ;;  %773 = vrot.lane.b32.xlu1 %v171_v54, %s2580_s4 }
 0x186   :  { %v226_v63 = vcombine.low %v202_v57, %v218_v55  ;;  %v227_v0 = vcombine.high %v202_v57, %v218_v55  ;;  %v242_v1 = vcombine.low %v209_v58, %v225_v56  ;;  %v243_v2 = vcombine.high %v209_v58, %v225_v56  ;;  %766 = vrot.lane.b32.xlu0 %v171_v54, %s2581_s15 }
 0x187   :  { %v405_v3 = vrot.slane %v398_v59, %v2673_v31  ;;  %v413_v4 = vrot.slane %v2258_v60, %v2673_v31  ;;  %v421_v5 = vrot.slane %v414_v61, %v2673_v31  ;;  %v429_v6 = vrot.slane %v2259_v62, %v2673_v31 }
 0x188   :  { %v234_v7 = vrot.slane %v226_v63, %v2682_v36  ;;  %v241_v8 = vrot.slane %v227_v0, %v2682_v36  ;;  %v250_v9 = vrot.slane %v242_v1, %v2682_v36  ;;  %v257_v10 = vrot.slane %v243_v2, %v2682_v36  ;;  %v469_v52 = vpop.permute.xlu0 %468 }
 0x189   :  { %771 = vrot.lane.b32.xlu1 %v2646_v16, %s2580_s4  ;;  %v430_v11 = vcombine.low %v405_v3, %v413_v4  ;;  %v431_v12 = vcombine.high %v405_v3, %v413_v4  ;;  %v446_v13 = vcombine.low %v421_v5, %v429_v6  ;;  %v447_v14 = vcombine.high %v421_v5, %v429_v6 }
 0x18a   :  { %764 = vrot.lane.b32.xlu0 %v2646_v16, %s2581_s15  ;;  %v330_v18 = vcombine.low %v234_v7, %v241_v8  ;;  %v2256_v19 = vcombine.high %v234_v7, %v241_v8  ;;  %v346_v20 = vcombine.low %v250_v9, %v257_v10  ;;  %v2257_v22 = vcombine.high %v250_v9, %v257_v10 }
 0x18b   :  { %v2724_v23 = vrot.slane %v430_v11, %v2682_v36  ;;  %v2727_v24 = vrot.slane %v431_v12, %v2682_v36  ;;  %v2730_v25 = vrot.slane %v446_v13, %v2682_v36  ;;  %v2733_v26 = vrot.slane %v447_v14, %v2682_v36 }
 0x18c   :  { %v337_v28 = vrot.slane %v330_v18, %v2673_v31  ;;  %v345_v16 = vrot.slane %v2256_v19, %v2673_v31  ;;  %v353_v29 = vrot.slane %v346_v20, %v2673_v31  ;;  %v361_v30 = vrot.slane %v2257_v22, %v2673_v31 }
 0x18d   :  { %781 = vrot.lane.b32.xlu1 %v2667_v27, %s2585_s17  ;;  %v462_v33 = vcombine.low %v2724_v23, %v2730_v25  ;;  %v463_v34 = vcombine.high %v2724_v23, %v2730_v25  ;;  %v464_v35 = vcombine.low %v2727_v24, %v2733_v26  ;;  %v465_v37 = vcombine.high %v2727_v24, %v2733_v26 }
 0x18e   :  { %777 = vrot.lane.b32.xlu0 %v2648_v17, %s2585_s17  ;;  %v362_v38 = vcombine.low %v337_v28, %v345_v16  ;;  %v363_v39 = vcombine.high %v337_v28, %v345_v16  ;;  %v378_v40 = vcombine.low %v353_v29, %v361_v30  ;;  %v379_v41 = vcombine.high %v353_v29, %v361_v30 }
 0x190   :  { %v2752_v27 = vrot.slane %v362_v38, %v2682_v36  ;;  %v2755_v42 = vrot.slane %v378_v40, %v2682_v36  ;;  %v2758_v44 = vrot.slane %v363_v39, %v2682_v36  ;;  %v2761_v45 = vrot.slane %v379_v41, %v2682_v36 }
 0x192   :  { %v394_v17 = vcombine.low %v2752_v27, %v2755_v42  ;;  %v395_v46 = vcombine.high %v2752_v27, %v2755_v42  ;;  %v396_v47 = vcombine.low %v2758_v44, %v2761_v45  ;;  %v397_v48 = vcombine.high %v2758_v44, %v2761_v45 }
 0x194   :  { %2343 = vmatprep.mubr.msk.f32.mxu1 %vm1073_vm1, %v394_v17  ;;  %2357 = vmatprep.mubr.msk.f32.mxu0 %vm1073_vm1, %v396_v47 }
 0x1e7   :  { %v471_v50 = vpop.permute.xlu1 %470 }
 0x1eb   :  { %v473_v51 = vpop.permute.xlu1 %472 }
 0x1ef   :  { %v481_v53 = vpop.permute.xlu1 %480  ;;  %v477_v56 = vpop.permute.xlu0 %476 }
 0x1f0   :  { %v574_v54 = vcombine.low %v473_v51, %v481_v53  ;;  %v575_v55 = vcombine.high %v473_v51, %v481_v53  ;;  %v558_v57 = vcombine.low %v469_v52, %v477_v56  ;;  %v559_v58 = vcombine.high %v469_v52, %v477_v56 }
 0x1f2   :  { %v582_v59 = vrot.slane %v574_v54, %v2673_v31  ;;  %v589_v60 = vrot.slane %v575_v55, %v2673_v31  ;;  %v566_v61 = vrot.slane %v558_v57, %v2673_v31  ;;  %v573_v62 = vrot.slane %v559_v58, %v2673_v31 }
 0x1f3   :  { %v479_v63 = vpop.permute.xlu1 %478 }
 0x1f4   :  { %v506_v0 = vcombine.low %v471_v50, %v479_v63  ;;  %v507_v1 = vcombine.high %v471_v50, %v479_v63  ;;  %v475_v2 = vpop.permute.xlu0 %474  ;;  %v590_v3 = vcombine.low %v566_v61, %v582_v59  ;;  %v591_v4 = vcombine.high %v566_v61, %v582_v59 }
 0x1f5   :  { %v606_v5 = vcombine.low %v573_v62, %v589_v60  ;;  %v607_v6 = vcombine.high %v573_v62, %v589_v60  ;;  %v490_v9 = vcombine.low %v467_v49, %v475_v2  ;;  %v491_v10 = vcombine.high %v467_v49, %v475_v2 }
 0x1f6   :  { %v514_v7 = vrot.slane %v506_v0, %v2673_v31  ;;  %v521_v8 = vrot.slane %v507_v1, %v2673_v31  ;;  %v598_v11 = vrot.slane %v590_v3, %v2682_v36  ;;  %v605_v12 = vrot.slane %v591_v4, %v2682_v36 }
 0x1f7   :  { %v614_v13 = vrot.slane %v606_v5, %v2682_v36  ;;  %v621_v14 = vrot.slane %v607_v6, %v2682_v36  ;;  %v774_v18 = vpop.permute.xlu1 %773  ;;  %v498_v19 = vrot.slane %v490_v9, %v2673_v31  ;;  %v505_v20 = vrot.slane %v491_v10, %v2673_v31 }
 0x1f8   :  { %v767_v22 = vpop.permute.xlu0 %766  ;;  %789 = vrot.lane.b32.xlu0 %v774_v18, %s2585_s17  ;;  %v694_v16 = vcombine.low %v598_v11, %v605_v12  ;;  %v2262_v29 = vcombine.high %v598_v11, %v605_v12 }
 0x1f9   :  { %v770_v28 = vsel %vm768_vm2, %v2675_v32, %v767_v22  ;;  %v710_v30 = vcombine.low %v614_v13, %v621_v14  ;;  %v522_v38 = vcombine.low %v498_v19, %v514_v7  ;;  %v523_v39 = vcombine.high %v498_v19, %v514_v7 }
 0x1fa   :  { %v538_v40 = vcombine.low %v505_v20, %v521_v8  ;;  %v539_v41 = vcombine.high %v505_v20, %v521_v8  ;;  %785 = vrot.lane.b32.xlu1 %v770_v28, %s2585_s17  ;;  %v701_v17 = vrot.slane %v694_v16, %v2673_v31  ;;  %v709_v47 = vrot.slane %v2262_v29, %v2673_v31 }
 0x1fb   :  { %v717_v49 = vrot.slane %v710_v30, %v2673_v31  ;;  %v2263_v50 = vcombine.high %v614_v13, %v621_v14  ;;  %v530_v51 = vrot.slane %v522_v38, %v2682_v36  ;;  %v537_v32 = vrot.slane %v523_v39, %v2682_v36  ;;  %v2853_v23 = vpop.permute.xlu1 %771 }
 0x1fc   :  { %v546_v52 = vrot.slane %v538_v40, %v2682_v36  ;;  %v553_v53 = vrot.slane %v539_v41, %v2682_v36  ;;  %v765_v54 = vpop.permute.xlu0 %764  ;;  %v726_v56 = vcombine.low %v701_v17, %v709_v47  ;;  %v727_v57 = vcombine.high %v701_v17, %v709_v47 }
 0x1fd   :  { %v725_v55 = vrot.slane %v2263_v50, %v2673_v31  ;;  %v2799_v58 = vsel %vm768_vm2, %v2692_v43, %v765_v54  ;;  %v626_v59 = vcombine.low %v530_v51, %v537_v32  ;;  %v2260_v60 = vcombine.high %v530_v51, %v537_v32 }
 0x1fe   :  { %v642_v61 = vcombine.low %v546_v52, %v553_v53  ;;  %v2261_v62 = vcombine.high %v546_v52, %v553_v53  ;;  %v734_v63 = vrot.slane %v726_v56, %v2682_v36  ;;  %v741_v2 = vrot.slane %v727_v57, %v2682_v36 }
 0x1ff   :  { %v742_v0 = vcombine.low %v717_v49, %v725_v55  ;;  %v743_v1 = vcombine.high %v717_v49, %v725_v55  ;;  %v633_v3 = vrot.slane %v626_v59, %v2673_v31  ;;  %v641_v4 = vrot.slane %v2260_v60, %v2673_v31 }
 0x200   :  { %v649_v5 = vrot.slane %v642_v61, %v2673_v31  ;;  %v657_v6 = vrot.slane %v2261_v62, %v2673_v31  ;;  %v778_v25 = vpop.permute.xlu0 %777 }
 0x201   :  { %v750_v43 = vrot.slane %v742_v0, %v2682_v36  ;;  %v757_v7 = vrot.slane %v743_v1, %v2682_v36  ;;  %v658_v8 = vcombine.low %v633_v3, %v641_v4  ;;  %v659_v10 = vcombine.high %v633_v3, %v641_v4 }
 0x202   :  { %v674_v9 = vcombine.low %v649_v5, %v657_v6  ;;  %v675_v11 = vcombine.high %v649_v5, %v657_v6 }
 0x203   :  { %v758_v12 = vcombine.low %v734_v63, %v750_v43  ;;  %v760_v13 = vcombine.low %v741_v2, %v757_v7  ;;  %v666_v14 = vrot.slane %v658_v8, %v2682_v36  ;;  %v673_v19 = vrot.slane %v659_v10, %v2682_v36 }
 0x204   :  { %v682_v18 = vrot.slane %v674_v9, %v2682_v36  ;;  %v689_v20 = vrot.slane %v675_v11, %v2682_v36  ;;  %v759_v16 = vcombine.high %v734_v63, %v750_v43  ;;  %v761_v30 = vcombine.high %v741_v2, %v757_v7  ;;  %v1072_v43 = vld [vmem:[#allocation8 + $0x8] sm:$0xff]  ;;  %v1071_v9 = vld [vmem:[#allocation8] sm:$0xff] }
 0x205   :  { %2339 = vmatprep.subr.msk.mxu1 %vm1073_vm1, %v758_v12  ;;  %2353 = vmatprep.subr.msk.mxu0 %vm1073_vm1, %v760_v13 }
 0x206   :  { %2340 = vmatpush3.xpose.msk.msra.mxu1 %vm1073_vm1, %v758_v12  ;;  %2354 = vmatpush3.xpose.msk.msra.mxu0 %vm1073_vm1, %v760_v13  ;;  %v690_v22 = vcombine.low %v666_v14, %v682_v18  ;;  %v692_v28 = vcombine.low %v673_v19, %v689_v20  ;;  %v691_v29 = vcombine.high %v666_v14, %v682_v18 }
 0x208   :  { %2341 = vmatprep.subr.msk.mxu1 %vm1073_vm1, %v690_v22  ;;  %2355 = vmatprep.subr.msk.mxu0 %vm1073_vm1, %v692_v28 }
 0x20a   :  { %2342 = vmatpush3.xpose.msk.msra.mxu1 %vm1073_vm1, %v690_v22  ;;  %2356 = vmatpush3.xpose.msk.msra.mxu0 %vm1073_vm1, %v692_v28 }
 0x20b   :  { %2346 = vmatprep.subr.msk.mxu1 %vm1073_vm1, %v759_v16 }
 0x20d   :  { %2344 = vmatmul.mubr.msk.f32.vlgmr.msra.gmra.mxu1 %vm1073_vm1, %v462_v33  ;;  %2358 = vmatmul.mubr.msk.f32.vlgmr.msra.gmra.mxu0 %vm1073_vm1, %v464_v35  ;;  %v693_v33 = vcombine.high %v673_v19, %v689_v20 }
 0x20e   :  { %2347 = vmatpush3.xpose.msk.msra.mxu1 %vm1073_vm1, %v759_v16  ;;  %2350 = vmatprep.mubr.msk.f32.mxu1 %vm1073_vm1, %v395_v46 }
 0x20f   :  { %2348 = vmatprep.subr.msk.mxu1 %vm1073_vm1, %v691_v29 }
 0x212   :  { %2349 = vmatpush3.xpose.msk.msra.mxu1 %vm1073_vm1, %v691_v29 }
 0x213   :  { %2360 = vmatprep.subr.msk.mxu1 %vm1073_vm1, %v761_v30 }
 0x215   :  { %2351 = vmatmul.mubr.msk.f32.vlgmr.msra.gmra.mxu1 %vm1073_vm1, %v463_v34  ;;  %v782_v34 = vpop.permute.xlu1 %781 }
 0x216   :  { %2361 = vmatpush3.xpose.msk.msra.mxu1 %vm1073_vm1, %v761_v30  ;;  %2364 = vmatprep.mubr.msk.f32.mxu1 %vm1073_vm1, %v397_v48 }
 0x217   :  { %2362 = vmatprep.subr.msk.mxu1 %vm1073_vm1, %v693_v33 }
 0x21a   :  { %2363 = vmatpush3.xpose.msk.msra.mxu1 %vm1073_vm1, %v693_v33 }
 0x21d   :  { %2365 = vmatmul.mubr.msk.f32.vlgmr.msra.gmra.mxu1 %vm1073_vm1, %v465_v37 }
 0x26a   :  { %v790_v35 = vpop.permute.xlu0 %789 }
 0x26b   :  { %v883_v27 = vcombine.low %v782_v34, %v790_v35  ;;  %v884_v42 = vcombine.high %v782_v34, %v790_v35 }
 0x26c   :  { %v786_v46 = vpop.permute.xlu1 %785 }
 0x26d   :  { %v891_v44 = vrot.slane %v883_v27, %v2673_v31  ;;  %v898_v45 = vrot.slane %v884_v42, %v2673_v31  ;;  %v867_v48 = vcombine.low %v778_v25, %v786_v46  ;;  %v868_v38 = vcombine.high %v778_v25, %v786_v46 }
 0x26f   :  { %v875_v39 = vrot.slane %v867_v48, %v2673_v31  ;;  %v882_v24 = vrot.slane %v868_v38, %v2673_v31 }
 0x271   :  { %v899_v26 = vcombine.low %v875_v39, %v891_v44  ;;  %v900_v37 = vcombine.high %v875_v39, %v891_v44  ;;  %v915_v40 = vcombine.low %v882_v24, %v898_v45  ;;  %v916_v41 = vcombine.high %v882_v24, %v898_v45 }
 0x273   :  { %v907_v17 = vrot.slane %v899_v26, %v2682_v36  ;;  %v914_v47 = vrot.slane %v900_v37, %v2682_v36  ;;  %v923_v49 = vrot.slane %v915_v40, %v2682_v36  ;;  %v930_v50 = vrot.slane %v916_v41, %v2682_v36 }
 0x275   :  { %v1003_v51 = vcombine.low %v907_v17, %v914_v47  ;;  %v2266_v32 = vcombine.high %v907_v17, %v914_v47  ;;  %v1019_v52 = vcombine.low %v923_v49, %v930_v50  ;;  %v2267_v53 = vcombine.high %v923_v49, %v930_v50 }
 0x277   :  { %v1010_v54 = vrot.slane %v1003_v51, %v2673_v31  ;;  %v1018_v55 = vrot.slane %v2266_v32, %v2673_v31  ;;  %v1026_v56 = vrot.slane %v1019_v52, %v2673_v31  ;;  %v1034_v57 = vrot.slane %v2267_v53, %v2673_v31 }
 0x279   :  { %v1035_v59 = vcombine.low %v1010_v54, %v1018_v55  ;;  %v1051_v60 = vcombine.low %v1026_v56, %v1034_v57  ;;  %v1036_v61 = vcombine.high %v1010_v54, %v1018_v55  ;;  %v1052_v62 = vcombine.high %v1026_v56, %v1034_v57 }
 0x27b   :  { %v1043_v63 = vrot.slane %v1035_v59, %v2682_v36  ;;  %v1059_v0 = vrot.slane %v1051_v60, %v2682_v36  ;;  %v1050_v1 = vrot.slane %v1036_v61, %v2682_v36  ;;  %v1066_v2 = vrot.slane %v1052_v62, %v2682_v36 }
 0x27d   :  { %v1067_v3 = vcombine.low %v1043_v63, %v1059_v0  ;;  %v2871_v4 = vcombine.high %v1043_v63, %v1059_v0  ;;  %v2873_v5 = vcombine.low %v1050_v1, %v1066_v2  ;;  %v2875_v6 = vcombine.high %v1050_v1, %v1066_v2 }
 0x27f   :  { %2367 = vmatprep.subr.mxu0 %v1067_v3 }
 0x280   :  { %2368 = vmatpush3.msra.mxu0 %v1067_v3 }
 0x2cd   :  { %v2345_v7 = vpop.f32.mrf.mxu1  ;;  %v2359_v8 = vpop.f32.mrf.mxu0 }
 0x2ce   :  { %v1158_v10 = vadd.f32 %v2345_v7, %v1072_v43  ;;  %v1332_v20 = vadd.f32 %v2359_v8, %v1072_v43 }
 0x2cf   :  { %v1152_v11 = vpop.f32.mrf.mxu1  ;;  %v1326_v12 = vpop.f32.mrf.mxu0 }
 0x2d0   :  { %v1153_v13 = vadd.f32 %v1152_v11, %v1071_v9  ;;  %v1327_v14 = vadd.f32 %v1326_v12, %v1071_v9  ;;  %v1426_v18 = vsel %vm1422_vm3, %v1158_v10, -inf  ;;  %v1438_v16 = vsel %vm1422_vm3, %v1332_v20, -inf }
 0x2d1   :  { %1427 = vmax.xlane.f32.xlu1 %v1426_v18 }
 0x2d2   :  { %v1423_v19 = vsel %vm1422_vm3, %v1153_v13, -inf  ;;  %v1435_v22 = vsel %vm1422_vm3, %v1327_v14, -inf }
 0x2d3   :  { %1424 = vmax.xlane.f32.xlu0 %v1423_v19 }
 0x2d5   :  { %1436 = vmax.xlane.f32.xlu1 %v1435_v22  ;;  %v2352_v28 = vpop.f32.mrf.mxu1 }
 0x2d6   :  { %v1245_v34 = vadd.f32 %v2352_v28, %v1072_v43 }
 0x2d7   :  { %v1239_v29 = vpop.f32.mrf.mxu1 }
 0x2d8   :  { %v1240_v35 = vadd.f32 %v1239_v29, %v1071_v9  ;;  %v1432_v27 = vsel %vm1422_vm3, %v1245_v34, -inf }
 0x2d9   :  { %1439 = vmax.xlane.f32.xlu1 %v1438_v16 }
 0x2da   :  { %v1429_v42 = vsel %vm1422_vm3, %v1240_v35, -inf }
 0x2dd   :  { %v2366_v30 = vpop.f32.mrf.mxu1 }
 0x2de   :  { %v2881_v33 = vadd.f32 %v2366_v30, %v1072_v43 }
 0x2df   :  { %v1413_v46 = vpop.f32.mrf.mxu1 }
 0x2e0   :  { %v1444_v25 = vsel %vm1422_vm3, %v2881_v33, -inf  ;;  %v2895_v44 = vadd.f32 %v1413_v46, %v1071_v9 }
 0x2e1   :  { %1445 = vmax.xlane.f32.xlu1 %v1444_v25 }
 0x2e9   :  { %775 = vrot.lane.b32.xlu0 %v2643_v15, %s2585_s17  ;;  %v1441_v15 = vsel %vm1422_vm3, %v2895_v44, -inf }
 0x2ed   :  { %779 = vrot.lane.b32.xlu0 %v2663_v21, %s2585_s17 }
 0x2f1   :  { %783 = vrot.lane.b32.xlu0 %v2799_v58, %s2585_s17 }
 0x310   :  { %1433 = vmax.xlane.f32.xlu0 %v1432_v27 }
 0x314   :  { %1430 = vmax.xlane.f32.xlu0 %v1429_v42 }
 0x32a   :  { %787 = vrot.lane.b32.xlu0 %v2853_v23, %s2585_s17 }
 0x349   :  { %1442 = vmax.xlane.f32.xlu0 %v1441_v15 }
 0x35a   :  { %v1428_v21 = vpop.xlane.xlu1 %1427 }
 0x35b   :  { %v1448_v58 = vsub.f32 %v1158_v10, %v1428_v21 }
 0x35c   :  { %v1425_v45 = vpop.xlane.xlu0 %1424 }
 0x35d   :  { %v1457_v48 = vmul.f32 1.442695, %v1448_v58  ;;  %v1447_v38 = vsub.f32 %v1153_v13, %v1425_v45 }
 0x35e   :  { %v1437_v39 = vpop.xlane.xlu1 %1436 }
 0x35f   :  { %2430 = vpow2.f32 %v1457_v48  ;;  %v1455_v24 = vmul.f32 1.442695, %v1447_v38  ;;  %v1451_v26 = vsub.f32 %v1327_v14, %v1437_v39 }
 0x360   :  { %v776_v50 = vpop.permute.xlu0 %775 }
 0x361   :  { %2432 = vpow2.f32 %v1455_v24  ;;  %v1463_v37 = vmul.f32 1.442695, %v1451_v26 }
 0x362   :  { %v1440_v52 = vpop.xlane.xlu1 %1439 }
 0x363   :  { %2434 = vpow2.f32 %v1463_v37  ;;  %v1452_v55 = vsub.f32 %v1332_v20, %v1440_v52 }
 0x364   :  { %v780_v51 = vpop.permute.xlu0 %779 }
 0x365   :  { %v1465_v60 = vmul.f32 1.442695, %v1452_v55 }
 0x368   :  { %v784_v32 = vpop.permute.xlu0 %783 }
 0x369   :  { %v799_v61 = vcombine.low %v776_v50, %v784_v32  ;;  %v800_v62 = vcombine.high %v776_v50, %v784_v32 }
 0x36b   :  { %v807_v3 = vrot.slane %v799_v61, %v2673_v31  ;;  %v814_v43 = vrot.slane %v800_v62, %v2673_v31 }
 0x36c   :  { %v2899_v23 = vpop.eup %2430 }
 0x36d   :  { %v1474_v40 = vsel %vm1422_vm3, %v2899_v23, 0.0 }
 0x36e   :  { %v2433_v41 = vpop.eup %2432  ;;  %1475 = vadd.xlane.f32.xlu1 %v1474_v40 }
 0x36f   :  { %2371 = vmatprep.mubr.msk.f32.mxu0 %vm1422_vm3, %v2433_v41  ;;  %v1471_v17 = vsel %vm1422_vm3, %v2433_v41, 0.0 }
 0x370   :  { %v2905_v47 = vpop.eup %2434 }
 0x371   :  { %v1483_v49 = vsel %vm1422_vm3, %v2905_v47, 0.0 }
 0x372   :  { %1472 = vadd.xlane.f32.xlu1 %v1471_v17 }
 0x376   :  { %1484 = vadd.xlane.f32.xlu1 %v1483_v49 }
 0x399   :  { %v1434_v53 = vpop.xlane.xlu0 %1433 }
 0x39a   :  { %v1450_v54 = vsub.f32 %v1245_v34, %v1434_v53 }
 0x39c   :  { %v1461_v56 = vmul.f32 1.442695, %v1450_v54 }
 0x39d   :  { %v1431_v57 = vpop.xlane.xlu0 %1430 }
 0x39e   :  { %2436 = vpow2.f32 %v1461_v56  ;;  %v1449_v59 = vsub.f32 %v1240_v35, %v1431_v57 }
 0x3a0   :  { %v1459_v63 = vmul.f32 1.442695, %v1449_v59 }
 0x3a1   :  { %v788_v0 = vpop.permute.xlu0 %787 }
 0x3a2   :  { %2438 = vpow2.f32 %v1459_v63  ;;  %v815_v1 = vcombine.low %v780_v51, %v788_v0  ;;  %v816_v2 = vcombine.high %v780_v51, %v788_v0 }
 0x3a3   :  { %2440 = vpow2.f32 %v1465_v60 }
 0x3a4   :  { %v823_v7 = vrot.slane %v815_v1, %v2673_v31  ;;  %v830_v8 = vrot.slane %v816_v2, %v2673_v31 }
 0x3a6   :  { %v831_v9 = vcombine.low %v807_v3, %v823_v7  ;;  %v832_v10 = vcombine.high %v807_v3, %v823_v7  ;;  %v847_v11 = vcombine.low %v814_v43, %v830_v8  ;;  %v848_v12 = vcombine.high %v814_v43, %v830_v8 }
 0x3a8   :  { %v839_v13 = vrot.slane %v831_v9, %v2682_v36  ;;  %v846_v14 = vrot.slane %v832_v10, %v2682_v36  ;;  %v855_v18 = vrot.slane %v847_v11, %v2682_v36  ;;  %v862_v19 = vrot.slane %v848_v12, %v2682_v36 }
 0x3aa   :  { %v935_v20 = vcombine.low %v839_v13, %v846_v14  ;;  %v2264_v22 = vcombine.high %v839_v13, %v846_v14  ;;  %v951_v28 = vcombine.low %v855_v18, %v862_v19  ;;  %v2265_v16 = vcombine.high %v855_v18, %v862_v19 }
 0x3ab   :  { %v2437_v29 = vpop.eup %2436 }
 0x3ac   :  { %v1480_v30 = vsel %vm1422_vm3, %v2437_v29, 0.0  ;;  %v942_v25 = vrot.slane %v935_v20, %v2673_v31  ;;  %v950_v34 = vrot.slane %v2264_v22, %v2673_v31  ;;  %v958_v35 = vrot.slane %v951_v28, %v2673_v31 }
 0x3ad   :  { %1481 = vadd.xlane.f32.xlu0 %v1480_v30  ;;  %v966_v27 = vrot.slane %v2265_v16, %v2673_v31 }
 0x3ae   :  { %v967_v42 = vcombine.low %v942_v25, %v950_v34  ;;  %v968_v39 = vcombine.high %v942_v25, %v950_v34 }
 0x3af   :  { %v2439_v46 = vpop.eup %2438  ;;  %v983_v15 = vcombine.low %v958_v35, %v966_v27  ;;  %v984_v24 = vcombine.high %v958_v35, %v966_v27 }
 0x3b0   :  { %v2441_v21 = vpop.eup %2440  ;;  %v1477_v58 = vsel %vm1422_vm3, %v2439_v46, 0.0  ;;  %v975_v45 = vrot.slane %v967_v42, %v2682_v36  ;;  %v982_v40 = vrot.slane %v968_v39, %v2682_v36 }
 0x3b1   :  { %1478 = vadd.xlane.f32.xlu1 %v1477_v58  ;;  %v991_v48 = vrot.slane %v983_v15, %v2682_v36  ;;  %v1486_v26 = vsel %vm1422_vm3, %v2441_v21, 0.0  ;;  %v998_v41 = vrot.slane %v984_v24, %v2682_v36 }
 0x3b3   :  { %v999_v38 = vcombine.low %v975_v45, %v991_v48  ;;  %v1000_v37 = vcombine.high %v975_v45, %v991_v48  ;;  %v1001_v17 = vcombine.low %v982_v40, %v998_v41 }
 0x3b5   :  { %2369 = vmatprep.subr.mxu0 %v999_v38  ;;  %1487 = vadd.xlane.f32.xlu1 %v1486_v26 }
 0x3b6   :  { %2370 = vmatpush3.msra.mxu0 %v999_v38 }
 0x3b7   :  { %2372 = vmatmul.mubr.msk.f32.vlgmr.msra.gmra.mxu0 %vm1422_vm3, %v2899_v23  ;;  %2374 = vmatprep.subr.mxu0 %v2871_v4  ;;  %v1446_v23 = vpop.xlane.xlu1 %1445 }
 0x3b8   :  { %2375 = vmatpush3.msra.mxu0 %v2871_v4  ;;  %2378 = vmatprep.mubr.msk.f32.mxu0 %vm1422_vm3, %v2439_v46  ;;  %v1002_v4 = vcombine.high %v982_v40, %v998_v41  ;;  %v1454_v49 = vsub.f32 %v2881_v33, %v1446_v23  ;;  %v2144_v23 = vld [vmem:[#allocation7 + $0x28] sm:$0xff] }
 0x3b9   :  { %2376 = vmatprep.subr.mxu0 %v1000_v37  ;;  %2395 = vmatprep.subr.mxu1 %v2144_v23 }
 0x3ba   :  { %2377 = vmatpush3.msra.mxu0 %v1000_v37  ;;  %v1469_v51 = vmul.f32 1.442695, %v1454_v49  ;;  %v2143_v49 = vld [vmem:[#allocation7 + $0x20] sm:$0xff]  ;;  %2396 = vmatpush3.msra.mxu1 %v2144_v23 }
 0x3bb   :  { %2379 = vmatmul.mubr.msk.f32.vlgmr.msra.gmra.mxu0 %vm1422_vm3, %v2437_v29  ;;  %2381 = vmatprep.subr.mxu0 %v2873_v5 }
 0x3bc   :  { %2382 = vmatpush3.msra.mxu0 %v2873_v5  ;;  %2385 = vmatprep.mubr.msk.f32.mxu0 %vm1422_vm3, %v2905_v47 }
 0x3bd   :  { %2383 = vmatprep.subr.mxu0 %v1001_v17  ;;  %2397 = vmatprep.subr.mxu1 %v2143_v49 }
 0x3be   :  { %2384 = vmatpush3.msra.mxu0 %v1001_v17  ;;  %2398 = vmatpush3.msra.mxu1 %v2143_v49 }
 0x3bf   :  { %2386 = vmatmul.mubr.msk.f32.vlgmr.msra.gmra.mxu0 %vm1422_vm3, %v2441_v21  ;;  %2388 = vmatprep.subr.mxu0 %v2875_v6 }
 0x3c0   :  { %2389 = vmatpush3.msra.mxu0 %v2875_v6 }
 0x3c1   :  { %2390 = vmatprep.subr.mxu0 %v1002_v4 }
 0x3c2   :  { %2391 = vmatpush3.msra.mxu0 %v1002_v4 }
 0x3d2   :  { %v1443_v50 = vpop.xlane.xlu0 %1442 }
 0x3d3   :  { %v1453_v5 = vsub.f32 %v2895_v44, %v1443_v50 }
 0x3d5   :  { %v1467_v32 = vmul.f32 1.442695, %v1453_v5 }
 0x3d7   :  { %2442 = vpow2.f32 %v1467_v32 }
 0x3d8   :  { %2444 = vpow2.f32 %v1469_v51 }
 0x3e4   :  { %v2443_v47 = vpop.eup %2442 }
 0x3e5   :  { %v2445_v52 = vpop.eup %2444  ;;  %2392 = vmatprep.mubr.msk.f32.mxu0 %vm1422_vm3, %v2443_v47  ;;  %v1489_v53 = vsel %vm1422_vm3, %v2443_v47, 0.0 }
 0x3e6   :  { %1490 = vadd.xlane.f32.xlu0 %v1489_v53  ;;  %2393 = vmatmul.mubr.msk.f32.vlgmr.msra.gmra.mxu0 %vm1422_vm3, %v2445_v52  ;;  %v1492_v6 = vsel %vm1422_vm3, %v2445_v52, 0.0 }
 0x3ea   :  { %1493 = vadd.xlane.f32.xlu0 %v1492_v6 }
 0x3f7   :  { %v1476_v33 = vpop.xlane.xlu1 %1475 }
 0x3fb   :  { %v1473_v54 = vpop.xlane.xlu1 %1472 }
 0x3ff   :  { %v1485_v55 = vpop.xlane.xlu1 %1484 }
 0x436   :  { %v1482_v56 = vpop.xlane.xlu0 %1481 }
 0x43a   :  { %v1479_v44 = vpop.xlane.xlu1 %1478 }
 0x43e   :  { %v1488_v60 = vpop.xlane.xlu1 %1487 }
 0x43f   :  { %2446 = vrcp.f32 %v1488_v60 }
 0x440   :  { %2448 = vrcp.f32 %v1476_v33 }
 0x441   :  { %2450 = vrcp.f32 %v1473_v54 }
 0x442   :  { %2452 = vrcp.f32 %v1485_v55 }
 0x443   :  { %2454 = vrcp.f32 %v1482_v56 }
 0x44c   :  { %v2447_v2 = vpop.eup %2446 }
 0x44d   :  { %v2449_v3 = vpop.eup %2448 }
 0x44e   :  { %v2451_v7 = vpop.eup %2450 }
 0x44f   :  { %v2453_v9 = vpop.eup %2452 }
 0x450   :  { %v2455_v11 = vpop.eup %2454 }
 0x46f   :  { %v1491_v59 = vpop.xlane.xlu0 %1490 }
 0x473   :  { %v1494_v62 = vpop.xlane.xlu0 %1493 }
 0x474   :  { %2456 = vrcp.f32 %v1494_v62  ;;  %v2141_v62 = vld [vmem:[#allocation7 + $0x10] sm:$0xff] }
 0x475   :  { %2458 = vrcp.f32 %v1479_v44 }
 0x476   :  { %2460 = vrcp.f32 %v1491_v59 }
 0x477   :  { %v2373_v57 = vpop.f32.mrf.mxu0 }
 0x478   :  { %v1828_v10 = vmul.f32 %v2449_v3, %v2373_v57 }
 0x479   :  { %v1567_v61 = vpop.f32.mrf.mxu0 }
 0x47a   :  { %v1827_v29 = vmul.f32 %v2451_v7, %v1567_v61  ;;  %v2142_v61 = vld [vmem:[#allocation7 + $0x18] sm:$0xff] }
 0x47b   :  { %v2380_v63 = vpop.f32.mrf.mxu0  ;;  %2399 = vmatprep.subr.mxu1 %v2142_v61 }
 0x47c   :  { %v1830_v22 = vmul.f32 %v2455_v11, %v2380_v63  ;;  %2400 = vmatpush3.msra.mxu1 %v2142_v61 }
 0x47d   :  { %v1648_v0 = vpop.f32.mrf.mxu0  ;;  %2401 = vmatprep.subr.mxu1 %v2141_v62 }
 0x47e   :  { %2402 = vmatpush3.msra.mxu1 %v2141_v62 }
 0x47f   :  { %v2387_v1 = vpop.f32.mrf.mxu0 }
 0x480   :  { %v1832_v43 = vmul.f32 %v2447_v2, %v2387_v1 }
 0x481   :  { %v1729_v8 = vpop.f32.mrf.mxu0  ;;  %v2457_v12 = vpop.eup %2456 }
 0x482   :  { %v1903_v13 = vcombine.low %v1828_v10, %v1832_v43  ;;  %v1904_v14 = vcombine.high %v1828_v10, %v1832_v43  ;;  %v1831_v18 = vmul.f32 %v2453_v9, %v1729_v8  ;;  %v2459_v20 = vpop.eup %2458 }
 0x483   :  { %v2461_v16 = vpop.eup %2460  ;;  %v1829_v25 = vmul.f32 %v2459_v20, %v1648_v0  ;;  %v2140_v20 = vld [vmem:[#allocation7 + $0x8] sm:$0xff] }
 0x484   :  { %v1911_v42 = vrot.slane %v1903_v13, %v2673_v31  ;;  %v1918_v46 = vrot.slane %v1904_v14, %v2673_v31  ;;  %v1835_v15 = vcombine.low %v1827_v29, %v1831_v18  ;;  %v1836_v21 = vcombine.high %v1827_v29, %v1831_v18  ;;  %2403 = vmatprep.subr.mxu1 %v2140_v20 }
 0x485   :  { %2404 = vmatpush3.msra.mxu1 %v2140_v20 }
 0x486   :  { %v1843_v40 = vrot.slane %v1835_v15, %v2673_v31  ;;  %v1850_v41 = vrot.slane %v1836_v21, %v2673_v31 }
 0x4a6   :  { %v2394_v19 = vpop.f32.mrf.mxu0 }
 0x4a7   :  { %v1834_v28 = vmul.f32 %v2457_v12, %v2394_v19 }
 0x4a8   :  { %v1810_v30 = vpop.f32.mrf.mxu0 }
 0x4a9   :  { %v1919_v34 = vcombine.low %v1830_v22, %v1834_v28  ;;  %v1920_v35 = vcombine.high %v1830_v22, %v1834_v28  ;;  %v1833_v27 = vmul.f32 %v2461_v16, %v1810_v30 }
 0x4ab   :  { %v1927_v58 = vrot.slane %v1919_v34, %v2673_v31  ;;  %v1934_v45 = vrot.slane %v1920_v35, %v2673_v31  ;;  %v1851_v48 = vcombine.low %v1829_v25, %v1833_v27  ;;  %v1852_v38 = vcombine.high %v1829_v25, %v1833_v27  ;;  %v2139_v27 = vld [vmem:[#allocation7] sm:$0xff] }
 0x4ac   :  { %2405 = vmatprep.subr.mxu1 %v2139_v27 }
 0x4ad   :  { %v1935_v39 = vcombine.low %v1911_v42, %v1927_v58  ;;  %v1936_v24 = vcombine.high %v1911_v42, %v1927_v58  ;;  %v1951_v26 = vcombine.low %v1918_v46, %v1934_v45  ;;  %v1952_v37 = vcombine.high %v1918_v46, %v1934_v45  ;;  %2406 = vmatpush3.msra.mxu1 %v2139_v27 }
 0x4ae   :  { %v1859_v17 = vrot.slane %v1851_v48, %v2673_v31  ;;  %v1866_v4 = vrot.slane %v1852_v38, %v2673_v31 }
 0x4af   :  { %v1943_v50 = vrot.slane %v1935_v39, %v2682_v36  ;;  %v1950_v5 = vrot.slane %v1936_v24, %v2682_v36  ;;  %v1959_v51 = vrot.slane %v1951_v26, %v2682_v36  ;;  %v1966_v32 = vrot.slane %v1952_v37, %v2682_v36 }
 0x4b0   :  { %v1867_v47 = vcombine.low %v1843_v40, %v1859_v17  ;;  %v1868_v52 = vcombine.high %v1843_v40, %v1859_v17  ;;  %v1883_v53 = vcombine.low %v1850_v41, %v1866_v4  ;;  %v1884_v6 = vcombine.high %v1850_v41, %v1866_v4 }
 0x4b1   :  { %v2039_v33 = vcombine.low %v1943_v50, %v1950_v5  ;;  %v2294_v54 = vcombine.high %v1943_v50, %v1950_v5  ;;  %v2055_v55 = vcombine.low %v1959_v51, %v1966_v32  ;;  %v2295_v44 = vcombine.high %v1959_v51, %v1966_v32 }
 0x4b2   :  { %v1875_v56 = vrot.slane %v1867_v47, %v2682_v36  ;;  %v1882_v57 = vrot.slane %v1868_v52, %v2682_v36  ;;  %v1891_v59 = vrot.slane %v1883_v53, %v2682_v36  ;;  %v1898_v60 = vrot.slane %v1884_v6, %v2682_v36  ;;  %v2296_v47 = vld [vmem:[%s2997_s3] ss:$0 sm:$0xff] }
 0x4b3   :  { %v2046_v63 = vrot.slane %v2039_v33, %v2673_v31  ;;  %v2054_v0 = vrot.slane %v2294_v54, %v2673_v31  ;;  %v2062_v1 = vrot.slane %v2055_v55, %v2673_v31  ;;  %v2070_v2 = vrot.slane %v2295_v44, %v2673_v31 }
 0x4b4   :  { %v1971_v3 = vcombine.low %v1875_v56, %v1882_v57  ;;  %v2292_v43 = vcombine.high %v1875_v56, %v1882_v57  ;;  %v1987_v7 = vcombine.low %v1891_v59, %v1898_v60  ;;  %v2293_v8 = vcombine.high %v1891_v59, %v1898_v60 }
 0x4b5   :  { %v2072_v9 = vcombine.high %v2046_v63, %v2054_v0  ;;  %v2088_v10 = vcombine.high %v2062_v1, %v2070_v2  ;;  %v2071_v11 = vcombine.low %v2046_v63, %v2054_v0  ;;  %v2087_v12 = vcombine.low %v2062_v1, %v2070_v2 }
 0x4b6   :  { %v1978_v13 = vrot.slane %v1971_v3, %v2673_v31  ;;  %v1986_v14 = vrot.slane %v2292_v43, %v2673_v31  ;;  %v1994_v18 = vrot.slane %v1987_v7, %v2673_v31  ;;  %v2002_v19 = vrot.slane %v2293_v8, %v2673_v31 }
 0x4b7   :  { %v2086_v22 = vrot.slane %v2072_v9, %v2682_v36  ;;  %v2102_v28 = vrot.slane %v2088_v10, %v2682_v36  ;;  %v2079_v16 = vrot.slane %v2071_v11, %v2682_v36  ;;  %v2095_v29 = vrot.slane %v2087_v12, %v2682_v36 }
 0x4b8   :  { %v2003_v30 = vcombine.low %v1978_v13, %v1986_v14  ;;  %v2019_v25 = vcombine.low %v1994_v18, %v2002_v19  ;;  %v2004_v34 = vcombine.high %v1978_v13, %v1986_v14  ;;  %v2020_v35 = vcombine.high %v1994_v18, %v2002_v19 }
 0x4b9   :  { %v2105_v42 = vcombine.low %v2086_v22, %v2102_v28  ;;  %v2104_v46 = vcombine.high %v2079_v16, %v2095_v29  ;;  %v2103_v31 = vcombine.low %v2079_v16, %v2095_v29  ;;  %v2106_v26 = vcombine.high %v2086_v22, %v2102_v28 }
 0x4ba   :  { %v2011_v15 = vrot.slane %v2003_v30, %v2682_v36  ;;  %v2027_v21 = vrot.slane %v2019_v25, %v2682_v36  ;;  %v2018_v58 = vrot.slane %v2004_v34, %v2682_v36  ;;  %v2034_v45 = vrot.slane %v2020_v35, %v2682_v36 }
 0x4bb   :  { %2119 = vrot.lane.b32.xlu1 %v2105_v42, %s2586_s18  ;;  %2111 = vrot.lane.b32.xlu0 %v2104_v46, %s2587_s19 }
 0x4bc   :  { %v2035_v48 = vcombine.low %v2011_v15, %v2027_v21  ;;  %v2036_v38 = vcombine.high %v2011_v15, %v2027_v21  ;;  %v2038_v39 = vcombine.high %v2018_v58, %v2034_v45  ;;  %v2037_v24 = vcombine.low %v2018_v58, %v2034_v45 }
 0x4bf   :  { %2109 = vrot.lane.b32.xlu1 %v2036_v38, %s2587_s19  ;;  %2125 = vrot.lane.b32.xlu0 %v2038_v39, %s2588_s20 }
 0x4c3   :  { %2117 = vrot.lane.b32.xlu1 %v2037_v24, %s2586_s18 }
 0x4c7   :  { %2127 = vrot.lane.b32.xlu1 %v2106_v26, %s2588_s20 }
 0x52d   :  { %v2120_v37 = vpop.permute.xlu1 %2119  ;;  %v2112_v40 = vpop.permute.xlu0 %2111 }
 0x52e   :  { %v2132_v4 = vsel %vm1073_vm1, %v2103_v31, %v2112_v40 }
 0x52f   :  { %v2135_v51 = vsel %vm2133_vm5, %v2132_v4, %v2120_v37 }
 0x531   :  { %v2110_v41 = vpop.permute.xlu1 %2109  ;;  %v2126_v23 = vpop.permute.xlu0 %2125 }
 0x532   :  { %v2131_v36 = vsel %vm1073_vm1, %v2035_v48, %v2110_v41 }
 0x535   :  { %v2118_v17 = vpop.permute.xlu1 %2117 }
 0x536   :  { %v2134_v49 = vsel %vm2133_vm5, %v2131_v36, %v2118_v17 }
 0x537   :  { %v2137_v50 = vsel %vm2136_vm4, %v2134_v49, %v2126_v23 }
 0x538   :  { %2407 = vmatprep.mubr.msk.f32.mxu1 %vm90_vm0, %v2137_v50 }
 0x539   :  { %v2128_v5 = vpop.permute.xlu1 %2127 }
 0x53a   :  { %v2138_v32 = vsel %vm2136_vm4, %v2135_v51, %v2128_v5 }
 0x53b   :  { %2408 = vmatmul.mubr.msk.f32.vlgmr.msra.gmra.mxu1 %vm90_vm0, %v2138_v32 }
 0x5fb   :  { %v2409_v52 = vpop.f32.mrf.mxu1 }
 0x5fc   :  { %v2230_v53 = vadd.f32 %v2409_v52, %v2296_v47 }
 0x5fd   :  { %v2224_v6 = vpop.f32.mrf.mxu1 }
 0x5fe   :  { %2234 = vst.msk [vmem:[#allocation10 + $0x8] sm:$0xff] %vm90_vm0, %v2230_v53  ;;  %v2225_v33 = vadd.f32 %v2296_v47, %v2224_v6 }
 0x600   :  { %2233 = vst.msk [vmem:[#allocation10] sm:$0xff] %vm90_vm0, %v2225_v33 }
 0x601   :  { %2553 = shalt.err (!%p2550_p10)
}
 0x602   :  { %2246 = dma.vmem_to_hbm [thread:$0]  %s2241_s24, 256, %s2999_s5, [#allocation4], %s2574_s28, %s2574_s28, %s2575_s29  }
 0x603   :  { %2568 = dma.done.wait [#allocation4], 256  }
 0x604   :  { %2569 = vsyncadd [#allocation4], 4294967040 }
 0x605   :  { %2250 = vsyncpa [#allocation3], 1 }
 0x606   :  { %2251 = vsyncpa [#allocation6], 1 }
 0x607   :  { %2252 = vsyncpa [#allocation9], 1 }
 0x608   :  { %2253 = vsyncpa [#allocation4], 1 }

</bundles_post_ra>
